<compile_context>
chip_gen: v6e
topology: v6e:2x2x1
jax: 0.10.0
libtpu: 0.0.40
codegen_flags: <defaults>
</compile_context>

<pallas_src>
import functools
import math

import jax
import jax.numpy as jnp
from jax import lax
from jax.experimental import pallas as pl
from jax.experimental.pallas import tpu as pltpu

_LANE = 128


def _round_up(n, m):
    return ((n + m - 1) // m) * m


def _auto_tile_b(batch, target=2048):
    """Pick the batch (lane-axis) tile.

    Small batches: one full-array block (block dim == array dim satisfies the
    (8,128) rule).  Large batches: an even number of ~`target`-lane tiles,
    each a multiple of 128 lanes, so a ("parallel",) grid splits evenly
    across v7x's two TensorCores (single-TC v5e/v6e just loop over tiles).
    """
    if batch <= 1024:
        return batch
    n_tiles = max(2, 2 * round(batch / (2 * target)))      # even tile count
    return _round_up(pl.cdiv(batch, n_tiles), _LANE)


def _value_net_kernel(xT_ref, w1_ref, b1_ref, w2_ref, b2_ref, w3_ref, b3_ref,
                      outT_ref, *, bf16_matmul, precision):
    """Fused 3-layer MLP on one batch tile, batch on the lane axis.

    xT_ref: [S, tile_b]   wN_ref: [out, in] (PyTorch layout)
    bN_ref: [out, 1]      outT_ref: [A, tile_b]
    """
    def mm(w_ref, act):
        if bf16_matmul:
            # Weights were pre-cast to bf16 once in the wrapper (HBM side);
            # only the activations are cast here.  f32 accumulation always.
            return jnp.dot(w_ref[...], act.astype(jnp.bfloat16),
                           preferred_element_type=jnp.float32)
        return jnp.dot(w_ref[...], act, precision=precision,
                       preferred_element_type=jnp.float32)

    xT = xT_ref[...]                                          # [S, tile_b]
    # Bias add + ReLU stay in f32 (the MXU accumulator dtype): lane-dense VPU
    # work, no bf16 convert pairs on v5e.
    h1 = jnp.maximum(mm(w1_ref, xT) + b1_ref[...], 0.0)       # [H, tile_b]
    h2 = jnp.maximum(mm(w2_ref, h1) + b2_ref[...], 0.0)       # [H, tile_b]
    outT = mm(w3_ref, h2) + b3_ref[...]                       # [A, tile_b]
    outT_ref[...] = outT.astype(outT_ref.dtype)


def value_network_forward(x, params, *, tile_b=None, use_bf16_matmul=False,
                          precision=lax.Precision.HIGHEST,
                          single_buffer_weights=False):
    """x: [B, state_dim] float32.  params: dict from init_value_network_params.

    Returns [B, action_dim] float32 with the same semantics as the PyTorch
    ValueNetwork forward pass.
    """
    w1, b1, w2, b2, w3, b3 = (params["w1"], params["b1"], params["w2"],
                              params["b2"], params["w3"], params["b3"])
    B, S = x.shape
    H = w1.shape[0]
    A = w3.shape[0]

    # Batch-in-lanes layout: one small transpose of x; batch -> lane axis.
    xT = x.T                                                  # [S, B]
    b1c = b1.reshape(H, 1)
    b2c = b2.reshape(H, 1)
    b3c = b3.reshape(A, 1)

    if use_bf16_matmul:
        # Opt-in accuracy trade (larger hidden sizes on v6e/v7x); halves
        # weight DMA / residency and avoids per-step weight casts in-kernel.
        w1, w2, w3 = (w.astype(jnp.bfloat16) for w in (w1, w2, w3))

    # Lane-axis batch tile: either the full batch (block == array dim) or a
    # multiple of 128 lanes.  No wrapper padding — the ragged last block is
    # clipped by Pallas (masked output writes; garbage lanes are independent).
    if tile_b is None:
        tile_b = _auto_tile_b(B)
    tile_b = min(int(tile_b), B)
    if tile_b < B:
        tile_b = min(_round_up(tile_b, _LANE), B)

    grid = (pl.cdiv(B, tile_b),)

    def resident(arr):
        # Constant index_map -> block stays VMEM-resident across grid steps
        # (no re-DMA).  Block == full array dims satisfies the (8,128) rule.
        nd = arr.ndim
        if single_buffer_weights:
            # A block whose index never changes does not need a second
            # pipeline buffer; matters only for large H on v7x's 64 MiB VMEM.
            return pl.BlockSpec(arr.shape, lambda i: (0,) * nd,
                                pipeline_mode=pl.Buffered(1))
        return pl.BlockSpec(arr.shape, lambda i: (0,) * nd)

    kernel = functools.partial(_value_net_kernel,
                               bf16_matmul=use_bf16_matmul,
                               precision=precision)

    outT = pl.pallas_call(
        kernel,
        out_shape=jax.ShapeDtypeStruct((A, B), jnp.float32),
        grid=grid,
        in_specs=[
            pl.BlockSpec((S, tile_b), lambda i: (0, i)),      # x^T: batch-tiled
            resident(w1), resident(b1c),
            resident(w2), resident(b2c),
            resident(w3), resident(b3c),
        ],
        out_specs=pl.BlockSpec((A, tile_b), lambda i: (0, i)),  # lane-dense
        compiler_params=pltpu.CompilerParams(
            # Batch tiles are independent: shards across both TensorCores on
            # v7x (tile picker keeps the split even), harmless on v5e/v6e.
            dimension_semantics=("parallel",),
        ),
    )(xT, w1, b1c, w2, b2c, w3, b3c)

    return outT.T                                             # [B, A]


def init_value_network_params(key, state_dim, action_dim, hidden_size):
    """Matches the PyTorch init: xavier_uniform_ weights, bias = 0.01.

    Weights use nn.Linear's native [out, in] layout (exactly what the
    transposed kernel consumes); biases are [out].
    """
    k1, k2, k3 = jax.random.split(key, 3)

    def xavier(k, fan_out, fan_in):
        limit = math.sqrt(6.0 / (fan_in + fan_out))
        return jax.random.uniform(k, (fan_out, fan_in), dtype=jnp.float32,
                                  minval=-limit, maxval=limit)

    return {
        "w1": xavier(k1, hidden_size, state_dim),
        "b1": jnp.full((hidden_size,), 0.01, dtype=jnp.float32),
        "w2": xavier(k2, hidden_size, hidden_size),
        "b2": jnp.full((hidden_size,), 0.01, dtype=jnp.float32),
        "w3": xavier(k3, action_dim, hidden_size),
        "b3": jnp.full((action_dim,), 0.01, dtype=jnp.float32),
    }


def _reference_forward(x, params, precision=lax.Precision.HIGHEST):
    """Pure-JAX reference of the PyTorch forward pass (same precision)."""
    def lin(a, w, b):
        return jnp.dot(a, w.T, precision=precision) + b
    h1 = jnp.maximum(lin(x, params["w1"], params["b1"]), 0.0)
    h2 = jnp.maximum(lin(h1, params["w2"], params["b2"]), 0.0)
    return lin(h2, params["w3"], params["b3"])


if __name__ == "__main__":
    # Small shapes consistent with the module: batch=2, state_dim=8,
    # hidden_size=32, action_dim=4.
    B, S, H, A = 2, 8, 32, 4
    key = jax.random.PRNGKey(0)
    kx, kp = jax.random.split(key)
    x = jax.random.normal(kx, (B, S), dtype=jnp.float32)
    params = init_value_network_params(kp, state_dim=S, action_dim=A,
                                       hidden_size=H)

    out = jax.block_until_ready(value_network_forward(x, params))
    ref = _reference_forward(x, params)
    assert out.shape == (B, A)
    assert jnp.allclose(out, ref, atol=1e-5, rtol=1e-5), "mismatch (small batch)"

    # Multi-tile path with a ragged last block and no wrapper padding:
    # grid = cdiv(1030, 512) = 3; the last block's out-of-bounds lanes read
    # unspecified data (independent columns) and their writes are masked.
    B2 = 1030
    x2 = jax.random.normal(jax.random.PRNGKey(1), (B2, S), dtype=jnp.float32)
    out2 = jax.block_until_ready(value_network_forward(x2, params, tile_b=512))
    ref2 = _reference_forward(x2, params)
    assert out2.shape == (B2, A)
    assert jnp.allclose(out2, ref2, atol=1e-4, rtol=1e-4), "mismatch (ragged tiles)"

    # Default auto-tiling on a larger batch: an even number of ~2k-lane tiles
    # (balanced across v7x's two TensorCores; single-TC chips just loop).
    B3 = 4100
    x3 = jax.random.normal(jax.random.PRNGKey(2), (B3, S), dtype=jnp.float32)
    out3 = jax.block_until_ready(value_network_forward(x3, params))
    ref3 = _reference_forward(x3, params)
    assert out3.shape == (B3, A)
    assert jnp.allclose(out3, ref3, atol=1e-4, rtol=1e-4), "mismatch (auto tiles)"

    print("KERNEL_OK")
</pallas_src>

<mosaic_0001>
module attributes {stable_mosaic.version = 11 : i64} {
  func.func @_value_net_kernel(%arg0: i32, %arg1: memref<8x2xf32, #tpu.memory_space<vmem>>, %arg2: memref<32x8xf32, #tpu.memory_space<vmem>>, %arg3: memref<32x1xf32, #tpu.memory_space<vmem>>, %arg4: memref<32x32xf32, #tpu.memory_space<vmem>>, %arg5: memref<32x1xf32, #tpu.memory_space<vmem>>, %arg6: memref<4x32xf32, #tpu.memory_space<vmem>>, %arg7: memref<4x1xf32, #tpu.memory_space<vmem>>, %arg8: memref<4x2xf32, #tpu.memory_space<vmem>>) attributes {dimension_semantics = [#tpu.dimension_semantics<parallel>], iteration_bounds = array<i64: 1>, scalar_prefetch = 0 : i64, scratch_operands = 0 : i64, tpu.core_type = #tpu.core_type<tc>, window_params = [{transform_indices = @transform_0, window_bounds = array<i64: 8, 2>}, {pipeline_mode = #tpu.pipeline_mode<synchronous>, transform_indices = @transform_1, window_bounds = array<i64: 32, 8>}, {pipeline_mode = #tpu.pipeline_mode<synchronous>, transform_indices = @transform_2, window_bounds = array<i64: 32, 1>}, {pipeline_mode = #tpu.pipeline_mode<synchronous>, transform_indices = @transform_3, window_bounds = array<i64: 32, 32>}, {pipeline_mode = #tpu.pipeline_mode<synchronous>, transform_indices = @transform_4, window_bounds = array<i64: 32, 1>}, {pipeline_mode = #tpu.pipeline_mode<synchronous>, transform_indices = @transform_5, window_bounds = array<i64: 4, 32>}, {pipeline_mode = #tpu.pipeline_mode<synchronous>, transform_indices = @transform_6, window_bounds = array<i64: 4, 1>}, {transform_indices = @transform_7, window_bounds = array<i64: 4, 2>}]} {
    %c0 = arith.constant 0 : index
    %c0_0 = arith.constant 0 : index
    %0 = vector.load %arg1[%c0, %c0_0] : memref<8x2xf32, #tpu.memory_space<vmem>>, vector<8x2xf32>
    %c0_1 = arith.constant 0 : index
    %c0_2 = arith.constant 0 : index
    %1 = vector.load %arg2[%c0_1, %c0_2] : memref<32x8xf32, #tpu.memory_space<vmem>>, vector<32x8xf32>
    %cst = arith.constant dense<0.000000e+00> : vector<32x2xf32>
    %2 = tpu.matmul %1, %0, %cst {dimension_numbers = #tpu.dot_dimension_numbers<[1], [0], [0], [1], [0, 0, 1, 1], [], []>, precision = #tpu.contract_precision<fp32>} : vector<32x8xf32>, vector<8x2xf32>, vector<32x2xf32> -> vector<32x2xf32>
    %c0_3 = arith.constant 0 : index
    %c0_4 = arith.constant 0 : index
    %3 = vector.load %arg3[%c0_3, %c0_4] : memref<32x1xf32, #tpu.memory_space<vmem>>, vector<32x1xf32>
    %4 = vector.broadcast %3 : vector<32x1xf32> to vector<32x2xf32>
    %5 = arith.addf %2, %4 : vector<32x2xf32>
    %cst_5 = arith.constant 0.000000e+00 : f32
    %6 = vector.broadcast %cst_5 : f32 to vector<32x2xf32>
    %7 = arith.maximumf %5, %6 : vector<32x2xf32>
    %c0_6 = arith.constant 0 : index
    %c0_7 = arith.constant 0 : index
    %8 = vector.load %arg4[%c0_6, %c0_7] : memref<32x32xf32, #tpu.memory_space<vmem>>, vector<32x32xf32>
    %cst_8 = arith.constant dense<0.000000e+00> : vector<32x2xf32>
    %9 = tpu.matmul %8, %7, %cst_8 {dimension_numbers = #tpu.dot_dimension_numbers<[1], [0], [0], [1], [0, 0, 1, 1], [], []>, precision = #tpu.contract_precision<fp32>} : vector<32x32xf32>, vector<32x2xf32>, vector<32x2xf32> -> vector<32x2xf32>
    %c0_9 = arith.constant 0 : index
    %c0_10 = arith.constant 0 : index
    %10 = vector.load %arg5[%c0_9, %c0_10] : memref<32x1xf32, #tpu.memory_space<vmem>>, vector<32x1xf32>
    %11 = vector.broadcast %10 : vector<32x1xf32> to vector<32x2xf32>
    %12 = arith.addf %9, %11 : vector<32x2xf32>
    %cst_11 = arith.constant 0.000000e+00 : f32
    %13 = vector.broadcast %cst_11 : f32 to vector<32x2xf32>
    %14 = arith.maximumf %12, %13 : vector<32x2xf32>
    %c0_12 = arith.constant 0 : index
    %c0_13 = arith.constant 0 : index
    %15 = vector.load %arg6[%c0_12, %c0_13] : memref<4x32xf32, #tpu.memory_space<vmem>>, vector<4x32xf32>
    %cst_14 = arith.constant dense<0.000000e+00> : vector<4x2xf32>
    %16 = tpu.matmul %15, %14, %cst_14 {dimension_numbers = #tpu.dot_dimension_numbers<[1], [0], [0], [1], [0, 0, 1, 1], [], []>, precision = #tpu.contract_precision<fp32>} : vector<4x32xf32>, vector<32x2xf32>, vector<4x2xf32> -> vector<4x2xf32>
    %c0_15 = arith.constant 0 : index
    %c0_16 = arith.constant 0 : index
    %17 = vector.load %arg7[%c0_15, %c0_16] : memref<4x1xf32, #tpu.memory_space<vmem>>, vector<4x1xf32>
    %18 = vector.broadcast %17 : vector<4x1xf32> to vector<4x2xf32>
    %19 = arith.addf %16, %18 : vector<4x2xf32>
    %c0_17 = arith.constant 0 : index
    %c0_18 = arith.constant 0 : index
    %20 = vector.load %arg8[%c0_17, %c0_18] : memref<4x2xf32, #tpu.memory_space<vmem>>, vector<4x2xf32>
    tpu.vector_store %arg8[%c0_17, %c0_18], %19 {strides = array<i32>} : memref<4x2xf32, #tpu.memory_space<vmem>>, vector<4x2xf32>,
    return
  }
  func.func @transform_0(%arg0: i32) -> (i32, i32) {
    %c0_i32 = arith.constant 0 : i32
    %c0_i32_0 = arith.constant 0 : i32
    return %c0_i32, %arg0 : i32, i32
  }
  func.func @transform_1(%arg0: i32) -> (i32, i32) {
    %c0_i32 = arith.constant 0 : i32
    %c0_i32_0 = arith.constant 0 : i32
    %c0_i32_1 = arith.constant 0 : i32
    return %c0_i32, %c0_i32_0 : i32, i32
  }
  func.func @transform_2(%arg0: i32) -> (i32, i32) {
    %c0_i32 = arith.constant 0 : i32
    %c0_i32_0 = arith.constant 0 : i32
    %c0_i32_1 = arith.constant 0 : i32
    return %c0_i32, %c0_i32_0 : i32, i32
  }
  func.func @transform_3(%arg0: i32) -> (i32, i32) {
    %c0_i32 = arith.constant 0 : i32
    %c0_i32_0 = arith.constant 0 : i32
    %c0_i32_1 = arith.constant 0 : i32
    return %c0_i32, %c0_i32_0 : i32, i32
  }
  func.func @transform_4(%arg0: i32) -> (i32, i32) {
    %c0_i32 = arith.constant 0 : i32
    %c0_i32_0 = arith.constant 0 : i32
    %c0_i32_1 = arith.constant 0 : i32
    return %c0_i32, %c0_i32_0 : i32, i32
  }
  func.func @transform_5(%arg0: i32) -> (i32, i32) {
    %c0_i32 = arith.constant 0 : i32
    %c0_i32_0 = arith.constant 0 : i32
    %c0_i32_1 = arith.constant 0 : i32
    return %c0_i32, %c0_i32_0 : i32, i32
  }
  func.func @transform_6(%arg0: i32) -> (i32, i32) {
    %c0_i32 = arith.constant 0 : i32
    %c0_i32_0 = arith.constant 0 : i32
    %c0_i32_1 = arith.constant 0 : i32
    return %c0_i32, %c0_i32_0 : i32, i32
  }
  func.func @transform_7(%arg0: i32) -> (i32, i32) {
    %c0_i32 = arith.constant 0 : i32
    %c0_i32_0 = arith.constant 0 : i32
    return %c0_i32, %arg0 : i32, i32
  }
}

</mosaic_0001>

<bundles_post_ra>
// kernel: tpu_custom_call.1
= control target key start
LH: loop header
LB: loop body
LE: loop exit
PB: predicated region body
PF: predicated region fallthrough
CT: control target
= control target key end

     0   :  { %vm55_vm0 = vcmask 64512   ;;  %v2118_v3 = vmov 0   ;;  %vm675_vm1 = vcmask 261120   ;;  %vm2120_vm2 = vmmov 0   ;;  %s2434_s0 = inlined_call_operand.vmem [shape: f32[8,2], index: 0, kind: input, shape index: {}]   ;;  %s2435_s1 = inlined_call_operand.vmem [shape: f32[32,8], index: 1, kind: input, shape index: {}]   ;;  %s2436_s2 = inlined_call_operand.vmem [shape: f32[32,1], index: 2, kind: input, shape index: {}]   ;;  %s2437_s4 = inlined_call_operand.vmem [shape: f32[32,1], index: 4, kind: input, shape index: {}]   ;;  %s2438_s6 = inlined_call_operand.vmem [shape: f32[4,1], index: 6, kind: input, shape index: {}]   ;;  %s2439_s3 = inlined_call_operand.vmem [shape: f32[32,32], index: 3, kind: input, shape index: {}]   ;;  %s2440_s5 = inlined_call_operand.vmem [shape: f32[4,32], index: 5, kind: input, shape index: {}]   ;;  %s2441_s7 = inlined_call_operand.vmem [shape: f32[4,2], index: 7, kind: output, shape index: {}]  }
   0x1   :  { %v26_v0 = vld [vmem:[%s2434_s0] sm:$0xff]  ;;  %v28_v2 = vld [vmem:[%s2435_s1 + $0x8] sm:$0xff]  ;;  %2116 = vset.pattern.permute.xlu0 %v2118_v3  ;;  %2117 = vset.pattern.permute.xlu1 %v2118_v3  ;;  %v29_v7 = vld [vmem:[%s2435_s1 + $0x10] sm:$0xff]  ;;  %vm1801_vm3 = vcmask 11264  }
   0x2   :  { %v27_v1 = vld [vmem:[%s2435_s1] sm:$0xff]  ;;  %v2170_v4 = vand.u32 4294901760, %v26_v0  ;;  %v60_v6 = vsel %vm55_vm0, %v28_v2, 0  ;;  %v30_v8 = vld [vmem:[%s2435_s1 + $0x18] sm:$0xff]  ;;  %v63_v12 = vsel %vm55_vm0, %v29_v7, 0  ;;  %v32_v14 = vld [vmem:[%s2436_s2 + $0x8] sm:$0xff] }
   0x3   :  { %v57_v5 = vsel %vm55_vm0, %v27_v1, 0  ;;  %v34_v9 = vld [vmem:[%s2436_s2 + $0x18] sm:$0xff]  ;;  %v2185_v11 = vand.u32 4294901760, %v60_v6  ;;  %v66_v13 = vsel %vm55_vm0, %v30_v8, 0  ;;  %v2194_v16 = vand.u32 4294901760, %v63_v12  ;;  %v33_v18 = vld [vmem:[%s2436_s2 + $0x10] sm:$0xff]  ;;  %42 = vperm.xlu1 %2117, %v32_v14  }
   0x4   :  { %v2183_v10 = vand.u32 4294901760, %v57_v5  ;;  %52 = vperm.xlu0 %2116, %v34_v9   ;;  %1915 = vmatprep.subr.mxu0 %v2170_v4  ;;  %v206_v15 = vsub.f32 %v26_v0, %v2170_v4  ;;  %v2196_v17 = vand.u32 4294901760, %v66_v13  ;;  %v31_v21 = vld [vmem:[%s2436_s2] sm:$0xff]  ;;  %v654_v30 = vld [vmem:[%s2437_s4 + $0x18] sm:$0xff]  ;;  %v653_v33 = vld [vmem:[%s2437_s4 + $0x10] sm:$0xff] }
   0x5   :  { %1916 = vmatpush3.msra.mxu0 %v2170_v4  ;;  %v145_v20 = vsub.f32 %v60_v6, %v2185_v11  ;;  %v155_v23 = vsub.f32 %v63_v12, %v2194_v16  ;;  %v652_v41 = vld [vmem:[%s2437_s4 + $0x8] sm:$0xff]  ;;  %v651_v42 = vld [vmem:[%s2437_s4] sm:$0xff] }
   0x6   :  { %v135_v19 = vsub.f32 %v57_v5, %v2183_v10  ;;  %1925 = vmatprep.mubr.f32.mxu1 %v2183_v10  ;;  %v207_v22 = vand.u32 4294901760, %v206_v15  ;;  %1931 = vmatprep.subr.mxu0 %v206_v15  ;;  %v165_v24 = vsub.f32 %v66_v13, %v2196_v17  ;;  %v1307_v43 = vld [vmem:[%s2438_s6] sm:$0xf]  ;;  %v648_v7 = vld [vmem:[%s2439_s3 + $0x8] sm:$0xff] }
   0x7   :  { %v146_v26 = vand.u32 4294901760, %v145_v20  ;;  %v156_v28 = vand.u32 4294901760, %v155_v23  ;;  %37 = vperm.xlu1 %2117, %v31_v21   ;;  %v647_v44 = vld [vmem:[%s2439_s3] sm:$0xff] }
   0x8   :  { %v136_v25 = vand.u32 4294901760, %v135_v19  ;;  %47 = vperm.xlu0 %2116, %v33_v18   ;;  %v208_v27 = vsub.f32 %v206_v15, %v207_v22  ;;  %v166_v29 = vand.u32 4294901760, %v165_v24  ;;  %v677_v45 = vsel %vm675_vm1, %v647_v44, 0  ;;  %v649_v18 = vld [vmem:[%s2439_s3 + $0x10] sm:$0xff] }
   0x9   :  { %v147_v32 = vsub.f32 %v145_v20, %v146_v26  ;;  %v157_v35 = vsub.f32 %v155_v23, %v156_v28  ;;  %v2244_v46 = vand.u32 4294901760, %v677_v45 }
   0xa   :  { %v137_v31 = vsub.f32 %v135_v19, %v136_v25  ;;  %v209_v34 = vand.u32 4294901760, %v208_v27  ;;  %v167_v36 = vsub.f32 %v165_v24, %v166_v29 }
   0xb   :  { %v148_v38 = vand.u32 4294901760, %v147_v32  ;;  %v158_v39 = vand.u32 4294901760, %v157_v35  ;;  %667 = vperm.xlu1 %2117, %v653_v33   ;;  %v2247_v47 = vsub.f32 %v677_v45, %v2244_v46 }
   0xc   :  { %v138_v37 = vand.u32 4294901760, %v137_v31  ;;  %672 = vperm.xlu0 %2116, %v654_v30   ;;  %1923 = vmatprep.subr.mxu1 %v209_v34  ;;  %v168_v40 = vand.u32 4294901760, %v167_v36 }
   0xd   :  { %1924 = vmatpush3.msra.mxu1 %v209_v34  ;;  %v759_v48 = vand.u32 4294901760, %v2247_v47 }
   0xe   :  { %1917 = vmatprep.mubr.f32.mxu0 %v138_v37  ;;  %1926 = vmatmul.mubr.f32.vlgmr.msra.gmra.mxu1 %v2185_v11 }
   0xf   :  { %1918 = vmatmul.mubr.f32.vlgmr.msra.gmra.mxu0 %v148_v38  ;;  %1939 = vmatprep.subr.mxu1 %v2170_v4  ;;  %v760_v49 = vsub.f32 %v2247_v47, %v759_v48 }
  0x10   :  { %1932 = vmatpush3.msra.mxu0 %v206_v15  ;;  %1920 = vmatprep.mubr.f32.mxu0 %v158_v39  ;;  %v680_v15 = vsel %vm675_vm1, %v648_v7, 0 }
  0x11   :  { %1928 = vmatprep.mubr.f32.mxu1 %v2194_v16  ;;  %1940 = vmatpush3.msra.mxu1 %v2170_v4  ;;  %v761_v50 = vand.u32 4294901760, %v760_v49 }
  0x12   :  { %1947 = vmatprep.subr.mxu0 %v207_v22  ;;  %1929 = vmatmul.mubr.f32.gmra.mxu1 %v2196_v17 }
  0x13   :  { %1921 = vmatmul.mubr.f32.gmra.mxu0 %v168_v40  ;;  %1941 = vmatprep.mubr.f32.mxu1 %v136_v25  ;;  %v650_v25 = vld [vmem:[%s2439_s3 + $0x18] sm:$0xff] }
  0x14   :  { %1933 = vmatprep.mubr.f32.mxu0 %v135_v19  ;;  %1955 = vmatprep.subr.mxu1 %v2170_v4  ;;  %v686_v35 = vsel %vm675_vm1, %v650_v25, 0 }
  0x15   :  { %662 = vperm.xlu0 %2116, %v652_v41   ;;  %657 = vperm.xlu1 %2117, %v651_v42   ;;  %v2273_v45 = vand.u32 4294901760, %v686_v35 }
  0x16   :  { %1942 = vmatmul.mubr.f32.vlgmr.msra.gmra.mxu1 %v146_v26 }
  0x17   :  { %1934 = vmatmul.mubr.f32.vlgmr.msra.gmra.mxu0 %v145_v20  ;;  %1944 = vmatprep.mubr.f32.mxu1 %v156_v28 }
  0x18   :  { %1948 = vmatpush3.msra.mxu0 %v207_v22  ;;  %1936 = vmatprep.mubr.f32.mxu0 %v155_v23 }
  0x19   :  { %1956 = vmatpush3.msra.mxu1 %v2170_v4  ;;  %1310 = vperm.xlu0 %2116, %v1307_v43  }
  0x1a   :  { %1945 = vmatmul.mubr.f32.gmra.mxu1 %v166_v29  ;;  %v683_v29 = vsel %vm675_vm1, %v649_v18, 0 }
  0x1b   :  { %1937 = vmatmul.mubr.f32.gmra.mxu0 %v165_v24  ;;  %1957 = vmatprep.mubr.f32.mxu1 %v2183_v10  ;;  %v2261_v24 = vand.u32 4294901760, %v680_v15  ;;  %v2271_v39 = vand.u32 4294901760, %v683_v29 }
  0x1c   :  { %1949 = vmatprep.mubr.f32.mxu0 %v2183_v10 }
  0x1d   :  { %v2269_v38 = vsub.f32 %v680_v15, %v2261_v24 }
  0x1e   :  { %1958 = vmatmul.mubr.f32.vlgmr.msra.gmra.mxu1 %v2185_v11 }
  0x1f   :  { %1950 = vmatmul.mubr.f32.vlgmr.msra.gmra.mxu0 %v2185_v11  ;;  %1960 = vmatprep.mubr.f32.mxu1 %v2194_v16 }
  0x20   :  { %1952 = vmatprep.mubr.f32.mxu0 %v2194_v16 }
  0x22   :  { %1961 = vmatmul.mubr.f32.gmra.mxu1 %v2196_v17 }
  0x23   :  { %1953 = vmatmul.mubr.f32.gmra.mxu0 %v2196_v17  ;;  %1985 = vmatprep.mubr.f32.mxu1 %v2244_v46 }
  0x24   :  { %1971 = vmatprep.mubr.f32.mxu0 %v761_v50 }
  0x7e   :  { %v43_v51 = vpop.permute.xlu1 %42 }
  0x7f   :  { %v53_v56 = vpop.permute.xlu0 %52 }
  0x82   :  { %v38_v57 = vpop.permute.xlu1 %37 }
  0x83   :  { %v48_v2 = vpop.permute.xlu0 %47 }
  0xce   :  { %v1927_v53 = vpop.f32.mrf.mxu1 }
  0xcf   :  { %v1919_v52 = vpop.f32.mrf.mxu0 }
  0xd0   :  { %v246_v55 = vpop.f32.mrf.mxu1  ;;  %v151_v60 = vadd.f32 %v1919_v52, %v43_v51 }
  0xd1   :  { %v140_v54 = vpop.f32.mrf.mxu0 }
  0xd2   :  { %v1930_v59 = vpop.f32.mrf.mxu1  ;;  %v141_v63 = vadd.f32 %v140_v54, %v38_v57  ;;  %v253_v3 = vadd.f32 %v1927_v53, %v151_v60  ;;  %v2278_v54 = vsub.f32 %v683_v29, %v2271_v39  ;;  %v769_v57 = vand.u32 4294901760, %v2269_v38  ;;  %v668_v29 = vpop.permute.xlu1 %667 }
  0xd3   :  { %v1922_v58 = vpop.f32.mrf.mxu0 }
  0xd4   :  { %v258_v62 = vpop.f32.mrf.mxu1  ;;  %v171_v4 = vadd.f32 %v1922_v58, %v53_v56  ;;  %v247_v8 = vadd.f32 %v246_v55, %v141_v63  ;;  %v779_v63 = vand.u32 4294901760, %v2278_v54 }
  0xd5   :  { %v160_v61 = vpop.f32.mrf.mxu0 }
  0xd6   :  { %v1943_v1 = vpop.f32.mrf.mxu1  ;;  %v161_v9 = vadd.f32 %v160_v61, %v48_v2  ;;  %v265_v13 = vadd.f32 %v1930_v59, %v171_v4  ;;  %v2284_v59 = vsub.f32 %v686_v35, %v2273_v45  ;;  %v770_v2 = vsub.f32 %v2269_v38, %v769_v57  ;;  %v658_v35 = vpop.permute.xlu1 %657 }
  0xd7   :  { %v1935_v0 = vpop.f32.mrf.mxu0  ;;  %v780_v7 = vsub.f32 %v2278_v54, %v779_v63 }
  0xd8   :  { %v433_v6 = vpop.f32.mrf.mxu1  ;;  %v346_v10 = vadd.f32 %v1935_v0, %v253_v3  ;;  %v259_v19 = vadd.f32 %v258_v62, %v161_v9  ;;  %v789_v4 = vand.u32 4294901760, %v2284_v59  ;;  %v771_v9 = vand.u32 4294901760, %v770_v2 }
  0xd9   :  { %v338_v5 = vpop.f32.mrf.mxu0 }
  0xda   :  { %v1946_v12 = vpop.f32.mrf.mxu1  ;;  %v339_v14 = vadd.f32 %v338_v5, %v247_v8  ;;  %v442_v20 = vadd.f32 %v1943_v1, %v346_v10 }
  0xdb   :  { %v1938_v11 = vpop.f32.mrf.mxu0 }
  0xdc   :  { %v449_v17 = vpop.f32.mrf.mxu1  ;;  %v360_v21 = vadd.f32 %v1938_v11, %v265_v13  ;;  %v434_v26 = vadd.f32 %v433_v6, %v339_v14 }
  0xdd   :  { %v352_v16 = vpop.f32.mrf.mxu0 }
  0xde   :  { %v1959_v23 = vpop.f32.mrf.mxu1  ;;  %v353_v27 = vadd.f32 %v352_v16, %v259_v19  ;;  %v458_v32 = vadd.f32 %v1946_v12, %v360_v21  ;;  %v790_v12 = vsub.f32 %v2284_v59, %v789_v4  ;;  %v781_v16 = vand.u32 4294901760, %v780_v7 }
  0xdf   :  { %v1951_v22 = vpop.f32.mrf.mxu0 }
  0xe0   :  { %v538_v28 = vadd.f32 %v1951_v22, %v442_v20  ;;  %v621_v31 = vpop.f32.mrf.mxu1  ;;  %v450_v40 = vadd.f32 %v449_v17, %v353_v27  ;;  %v791_v19 = vand.u32 4294901760, %v790_v12 }
  0xe1   :  { %v531_v30 = vpop.f32.mrf.mxu0 }
  0xe2   :  { %v628_v33 = vadd.f32 %v1959_v23, %v538_v28  ;;  %v532_v34 = vadd.f32 %v531_v30, %v434_v26  ;;  %v1962_v37 = vpop.f32.mrf.mxu1  ;;  %v673_v26 = vpop.permute.xlu0 %672 }
  0xe3   :  { %v1954_v36 = vpop.f32.mrf.mxu0 }
  0xe4   :  { %v644_v41 = vmax.f32 %v628_v33, 0.0  ;;  %v622_v42 = vadd.f32 %v621_v31, %v532_v34  ;;  %v550_v43 = vadd.f32 %v1954_v36, %v458_v32  ;;  %v633_v53 = vpop.f32.mrf.mxu1 }
  0xe5   :  { %v543_v44 = vpop.f32.mrf.mxu0 }
  0xe6   :  { %v643_v49 = vmax.f32 %v622_v42, 0.0  ;;  %v640_v50 = vadd.f32 %v1962_v37, %v550_v43  ;;  %v544_v51 = vadd.f32 %v543_v44, %v450_v40  ;;  %v2275_v52 = vand.u32 4294901760, %v644_v41  ;;  %v663_v32 = vpop.permute.xlu0 %662  ;;  %v1306_v43 = vld [vmem:[%s2440_s5] sm:$0xf] }
  0xe8   :  { %v646_v55 = vmax.f32 %v640_v50, 0.0  ;;  %v634_v56 = vadd.f32 %v633_v53, %v544_v51  ;;  %v2281_v58 = vand.u32 4294901760, %v643_v49  ;;  %v837_v62 = vsub.f32 %v644_v41, %v2275_v52 }
  0xea   :  { %v2286_v60 = vand.u32 4294901760, %v646_v55  ;;  %v645_v61 = vmax.f32 %v634_v56, 0.0  ;;  %v844_v3 = vsub.f32 %v643_v49, %v2281_v58  ;;  %v838_v8 = vand.u32 4294901760, %v837_v62 }
  0xeb   :  { %v1314_v56 = vsel %vm675_vm1, %v1306_v43, 0 }
  0xec   :  { %v823_v0 = vsub.f32 %v646_v55, %v2286_v60  ;;  %v2291_v1 = vand.u32 4294901760, %v645_v61  ;;  %1963 = vmatprep.subr.mxu0 %v2286_v60  ;;  %v845_v13 = vand.u32 4294901760, %v844_v3  ;;  %v839_v17 = vsub.f32 %v837_v62, %v838_v8 }
  0xed   :  { %1964 = vmatpush3.msra.mxu0 %v2286_v60 }
  0xee   :  { %v830_v5 = vsub.f32 %v645_v61, %v2291_v1  ;;  %1965 = vmatprep.subr.mxu0 %v2291_v1  ;;  %v824_v6 = vand.u32 4294901760, %v823_v0  ;;  %v846_v20 = vsub.f32 %v844_v3, %v845_v13  ;;  %v840_v21 = vand.u32 4294901760, %v839_v17 }
  0xef   :  { %1966 = vmatpush3.msra.mxu0 %v2291_v1 }
  0xf0   :  { %1967 = vmatprep.subr.mxu0 %v2275_v52  ;;  %v825_v10 = vsub.f32 %v823_v0, %v824_v6  ;;  %v831_v11 = vand.u32 4294901760, %v830_v5  ;;  %v847_v22 = vand.u32 4294901760, %v846_v20 }
  0xf1   :  { %1968 = vmatpush3.msra.mxu0 %v2275_v52 }
  0xf2   :  { %1969 = vmatprep.subr.mxu0 %v2281_v58  ;;  %v826_v14 = vand.u32 4294901760, %v825_v10  ;;  %v832_v15 = vsub.f32 %v830_v5, %v831_v11 }
  0xf3   :  { %1970 = vmatpush3.msra.mxu0 %v2281_v58 }
  0xf4   :  { %1972 = vmatmul.mubr.f32.vlgmr.msra.gmra.mxu0 %v771_v9  ;;  %1977 = vmatprep.subr.mxu1 %v826_v14  ;;  %v833_v18 = vand.u32 4294901760, %v832_v15 }
  0xf5   :  { %1991 = vmatprep.subr.mxu0 %v823_v0  ;;  %1978 = vmatpush3.msra.mxu1 %v826_v14 }
  0xf6   :  { %1992 = vmatpush3.msra.mxu0 %v823_v0  ;;  %1979 = vmatprep.subr.mxu1 %v833_v18 }
  0xf7   :  { %1993 = vmatprep.subr.mxu0 %v830_v5  ;;  %1974 = vmatprep.mubr.f32.mxu0 %v781_v16 }
  0xf8   :  { %1980 = vmatpush3.msra.mxu1 %v833_v18  ;;  %1994 = vmatpush3.msra.mxu0 %v830_v5 }
  0xf9   :  { %1975 = vmatmul.mubr.f32.gmra.mxu0 %v791_v19  ;;  %1981 = vmatprep.subr.mxu1 %v840_v21 }
  0xfa   :  { %1995 = vmatprep.subr.mxu0 %v837_v62  ;;  %1982 = vmatpush3.msra.mxu1 %v840_v21 }
  0xfb   :  { %1996 = vmatpush3.msra.mxu0 %v837_v62  ;;  %1983 = vmatprep.subr.mxu1 %v847_v22  ;;  %v2362_v62 = vand.u32 4294901760, %v1314_v56 }
  0xfc   :  { %1997 = vmatprep.subr.mxu0 %v844_v3  ;;  %1984 = vmatpush3.msra.mxu1 %v847_v22 }
  0xfd   :  { %1998 = vmatpush3.msra.mxu0 %v844_v3  ;;  %1986 = vmatmul.mubr.f32.vlgmr.msra.gmra.mxu1 %v2261_v24 }
  0xfe   :  { %1999 = vmatprep.mubr.f32.mxu0 %v2247_v47  ;;  %2005 = vmatprep.subr.mxu1 %v2286_v60  ;;  %v2119_v47 = vmov 0.0  }
  0xff   :  { %2019 = vmatprep.subr.mxu0 %v824_v6  ;;  %2000 = vmatmul.mubr.f32.vlgmr.msra.gmra.mxu0 %v2269_v38 }
 0x100   :  { %2006 = vmatpush3.msra.mxu1 %v2286_v60  ;;  %2020 = vmatpush3.msra.mxu0 %v824_v6 }
 0x101   :  { %2007 = vmatprep.subr.mxu1 %v2291_v1  ;;  %2021 = vmatprep.subr.mxu0 %v831_v11 }
 0x102   :  { %1988 = vmatprep.mubr.f32.mxu1 %v2271_v39  ;;  %2008 = vmatpush3.msra.mxu1 %v2291_v1 }
 0x103   :  { %2022 = vmatpush3.msra.mxu0 %v831_v11  ;;  %1989 = vmatmul.mubr.f32.gmra.mxu1 %v2273_v45 }
 0x104   :  { %2009 = vmatprep.subr.mxu1 %v2275_v52  ;;  %2023 = vmatprep.subr.mxu0 %v838_v8 }
 0x105   :  { %2002 = vmatprep.mubr.f32.mxu0 %v2278_v54  ;;  %2010 = vmatpush3.msra.mxu1 %v2275_v52 }
 0x106   :  { %2024 = vmatpush3.msra.mxu0 %v838_v8  ;;  %2011 = vmatprep.subr.mxu1 %v2281_v58  ;;  %v2365_v8 = vsub.f32 %v1314_v56, %v2362_v62 }
 0x107   :  { %2003 = vmatmul.mubr.f32.gmra.mxu0 %v2284_v59  ;;  %2025 = vmatprep.subr.mxu0 %v845_v13 }
 0x108   :  { %2012 = vmatpush3.msra.mxu1 %v2281_v58  ;;  %2013 = vmatprep.mubr.f32.mxu1 %v759_v48  ;;  %v1387_v18 = vand.u32 4294901760, %v2365_v8 }
 0x109   :  { %2026 = vmatpush3.msra.mxu0 %v845_v13  ;;  %2014 = vmatmul.mubr.f32.vlgmr.msra.gmra.mxu1 %v769_v57 }
 0x10a   :  { %2033 = vmatprep.subr.mxu1 %v2286_v60  ;;  %2027 = vmatprep.mubr.f32.mxu0 %v2244_v46 }
 0x10b   :  { %2034 = vmatpush3.msra.mxu1 %v2286_v60  ;;  %2028 = vmatmul.mubr.f32.vlgmr.msra.gmra.mxu0 %v2261_v24 }
 0x10c   :  { %2035 = vmatprep.subr.mxu1 %v2291_v1  ;;  %2016 = vmatprep.mubr.f32.mxu1 %v779_v63 }
 0x10d   :  { %2036 = vmatpush3.msra.mxu1 %v2291_v1  ;;  %2030 = vmatprep.mubr.f32.mxu0 %v2271_v39 }
 0x10e   :  { %2017 = vmatmul.mubr.f32.gmra.mxu1 %v789_v4  ;;  %2037 = vmatprep.subr.mxu1 %v2275_v52 }
 0x10f   :  { %2038 = vmatpush3.msra.mxu1 %v2275_v52  ;;  %2031 = vmatmul.mubr.f32.gmra.mxu0 %v2273_v45 }
 0x110   :  { %2039 = vmatprep.subr.mxu1 %v2281_v58  ;;  %2041 = vmatprep.mubr.f32.mxu1 %v2244_v46 }
 0x111   :  { %2040 = vmatpush3.msra.mxu1 %v2281_v58  ;;  %2047 = vmatprep.subr.mxu0 %v2119_v47 }
 0x112   :  { %2042 = vmatmul.mubr.f32.vlgmr.msra.gmra.mxu1 %v2261_v24  ;;  %2058 = vmatprep.subr.mxu1 %v2119_v47 }
 0x113   :  { %2044 = vmatprep.mubr.f32.mxu1 %v2271_v39  ;;  %2055 = vmatprep.mubr.msk.f32.mxu0 %vm2120_vm2, %v2119_v47 }
 0x116   :  { %2045 = vmatmul.mubr.f32.gmra.mxu1 %v2273_v45 }
 0x117   :  { %2066 = vmatprep.mubr.msk.f32.mxu1 %vm2120_vm2, %v2119_v47 }
 0x1b4   :  { %v1973_v46 = vpop.f32.mrf.mxu0 }
 0x1b5   :  { %v774_v33 = vadd.f32 %v1973_v46, %v663_v32 }
 0x1b6   :  { %v763_v48 = vpop.f32.mrf.mxu0 }
 0x1b7   :  { %v764_v36 = vadd.f32 %v763_v48, %v658_v35 }
 0x1b9   :  { %v1976_v23 = vpop.f32.mrf.mxu0 }
 0x1ba   :  { %v794_v39 = vadd.f32 %v1976_v23, %v673_v26  ;;  %v1388_v23 = vsub.f32 %v2365_v8, %v1387_v18 }
 0x1bb   :  { %v783_v24 = vpop.f32.mrf.mxu0 }
 0x1bc   :  { %v784_v44 = vadd.f32 %v783_v24, %v668_v29 }
 0x1bd   :  { %v1987_v25 = vpop.f32.mrf.mxu1 }
 0x1be   :  { %v891_v37 = vadd.f32 %v1987_v25, %v774_v33 }
 0x1bf   :  { %v884_v27 = vpop.f32.mrf.mxu1  ;;  %v2001_v28 = vpop.f32.mrf.mxu0 }
 0x1c0   :  { %v885_v40 = vadd.f32 %v884_v27, %v764_v36  ;;  %v990_v45 = vadd.f32 %v2001_v28, %v891_v37 }
 0x1c1   :  { %v982_v31 = vpop.f32.mrf.mxu0 }
 0x1c2   :  { %v983_v52 = vadd.f32 %v982_v31, %v885_v40 }
 0x1c3   :  { %v1990_v30 = vpop.f32.mrf.mxu1 }
 0x1c4   :  { %v903_v49 = vadd.f32 %v1990_v30, %v794_v39  ;;  %v1389_v30 = vand.u32 4294901760, %v1388_v23 }
 0x1c5   :  { %v896_v34 = vpop.f32.mrf.mxu1 }
 0x1c6   :  { %v897_v53 = vadd.f32 %v896_v34, %v784_v44 }
 0x1c7   :  { %v2004_v38 = vpop.f32.mrf.mxu0 }
 0x1c8   :  { %v1004_v58 = vadd.f32 %v2004_v38, %v903_v49  ;;  %v1311_v49 = vpop.permute.xlu0 %1310 }
 0x1c9   :  { %v996_v41 = vpop.f32.mrf.mxu0  ;;  %v2015_v42 = vpop.f32.mrf.mxu1 }
 0x1ca   :  { %v1089_v54 = vadd.f32 %v2015_v42, %v990_v45  ;;  %v997_v63 = vadd.f32 %v996_v41, %v897_v53 }
 0x1cb   :  { %v1080_v50 = vpop.f32.mrf.mxu1  ;;  %v2029_v51 = vpop.f32.mrf.mxu0 }
 0x1cc   :  { %v1081_v59 = vadd.f32 %v1080_v50, %v983_v52  ;;  %v1194_v0 = vadd.f32 %v2029_v51, %v1089_v54 }
 0x1cd   :  { %v1187_v55 = vpop.f32.mrf.mxu0 }
 0x1ce   :  { %v2018_v57 = vpop.f32.mrf.mxu1  ;;  %v1188_v3 = vadd.f32 %v1187_v55, %v1081_v59 }
 0x1cf   :  { %v2032_v61 = vpop.f32.mrf.mxu0  ;;  %v1105_v1 = vadd.f32 %v2018_v57, %v1004_v58 }
 0x1d0   :  { %v1096_v60 = vpop.f32.mrf.mxu1 }
 0x1d1   :  { %v1097_v4 = vadd.f32 %v1096_v60, %v997_v63  ;;  %v1199_v6 = vpop.f32.mrf.mxu0  ;;  %v1206_v9 = vadd.f32 %v2032_v61, %v1105_v1 }
 0x1d2   :  { %v2043_v2 = vpop.f32.mrf.mxu1 }
 0x1d3   :  { %v1287_v5 = vadd.f32 %v2043_v2, %v1194_v0  ;;  %v1200_v13 = vadd.f32 %v1199_v6, %v1097_v4 }
 0x1d4   :  { %v1280_v7 = vpop.f32.mrf.mxu1 }
 0x1d5   :  { %v1303_v10 = vmax.f32 %v1287_v5, 0.0  ;;  %v1281_v11 = vadd.f32 %v1280_v7, %v1188_v3 }
 0x1d6   :  { %v2046_v12 = vpop.f32.mrf.mxu1 }
 0x1d7   :  { %v2367_v14 = vand.u32 4294901760, %v1303_v10  ;;  %v1302_v15 = vmax.f32 %v1281_v11, 0.0  ;;  %v1299_v16 = vadd.f32 %v2046_v12, %v1206_v9 }
 0x1d8   :  { %v1292_v17 = vpop.f32.mrf.mxu1 }
 0x1d9   :  { %v2370_v19 = vand.u32 4294901760, %v1302_v15  ;;  %v1305_v20 = vmax.f32 %v1299_v16, 0.0  ;;  %v1293_v21 = vadd.f32 %v1292_v17, %v1200_v13  ;;  %v1435_v22 = vsub.f32 %v1303_v10, %v2367_v14 }
 0x1db   :  { %v2373_v46 = vand.u32 4294901760, %v1305_v20  ;;  %v1304_v48 = vmax.f32 %v1293_v21, 0.0  ;;  %v1442_v24 = vsub.f32 %v1302_v15, %v2370_v19  ;;  %v1436_v27 = vand.u32 4294901760, %v1435_v22 }
 0x1dd   :  { %v1421_v25 = vsub.f32 %v1305_v20, %v2373_v46  ;;  %v2380_v26 = vand.u32 4294901760, %v1304_v48  ;;  %2048 = vmatpush3.msra.mxu0 %v2373_v46  ;;  %v1443_v31 = vand.u32 4294901760, %v1442_v24  ;;  %v1437_v34 = vsub.f32 %v1435_v22, %v1436_v27 }
 0x1de   :  { %2049 = vmatprep.subr.mxu0 %v2119_v47 }
 0x1df   :  { %v1422_v28 = vand.u32 4294901760, %v1421_v25  ;;  %v1428_v29 = vsub.f32 %v1304_v48, %v2380_v26  ;;  %2050 = vmatpush3.msra.mxu0 %v2380_v26  ;;  %v1444_v37 = vsub.f32 %v1442_v24, %v1443_v31  ;;  %v1438_v39 = vand.u32 4294901760, %v1437_v34 }
 0x1e0   :  { %2051 = vmatprep.subr.mxu0 %v2119_v47 }
 0x1e1   :  { %v1423_v32 = vsub.f32 %v1421_v25, %v1422_v28  ;;  %v1429_v33 = vand.u32 4294901760, %v1428_v29  ;;  %2052 = vmatpush3.msra.mxu0 %v2367_v14  ;;  %v1445_v40 = vand.u32 4294901760, %v1444_v37 }
 0x1e2   :  { %2053 = vmatprep.subr.mxu0 %v2119_v47 }
 0x1e3   :  { %v1430_v35 = vsub.f32 %v1428_v29, %v1429_v33  ;;  %2054 = vmatpush3.msra.mxu0 %v2370_v19  ;;  %v1424_v36 = vand.u32 4294901760, %v1423_v32 }
 0x1e4   :  { %2056 = vmatmul.mubr.f32.vlgmr.msra.gmra.mxu0 %v1389_v30  ;;  %2069 = vmatprep.subr.mxu0 %v2119_v47 }
 0x1e5   :  { %2059 = vmatpush3.msra.mxu1 %v1424_v36  ;;  %2070 = vmatpush3.msra.mxu0 %v1421_v25  ;;  %v1431_v38 = vand.u32 4294901760, %v1430_v35 }
 0x1e6   :  { %2060 = vmatprep.subr.mxu1 %v2119_v47  ;;  %2071 = vmatprep.subr.mxu0 %v2119_v47 }
 0x1e7   :  { %2061 = vmatpush3.msra.mxu1 %v1431_v38  ;;  %2072 = vmatpush3.msra.mxu0 %v1428_v29 }
 0x1e8   :  { %2062 = vmatprep.subr.mxu1 %v2119_v47  ;;  %2073 = vmatprep.subr.mxu0 %v2119_v47 }
 0x1e9   :  { %2063 = vmatpush3.msra.mxu1 %v1438_v39  ;;  %2074 = vmatpush3.msra.mxu0 %v1435_v22 }
 0x1ea   :  { %2064 = vmatprep.subr.mxu1 %v2119_v47  ;;  %2075 = vmatprep.subr.mxu0 %v2119_v47 }
 0x1eb   :  { %2065 = vmatpush3.msra.mxu1 %v1445_v40  ;;  %2076 = vmatpush3.msra.mxu0 %v1442_v24 }
 0x1ec   :  { %2067 = vmatmul.mubr.f32.vlgmr.msra.gmra.mxu1 %v2362_v62  ;;  %2077 = vmatprep.mubr.msk.f32.mxu0 %vm2120_vm2, %v2119_v47 }
 0x1ed   :  { %2080 = vmatprep.subr.mxu1 %v2119_v47  ;;  %2091 = vmatprep.subr.mxu0 %v2119_v47 }
 0x1ee   :  { %2078 = vmatmul.mubr.f32.vlgmr.msra.gmra.mxu0 %v2365_v8  ;;  %2081 = vmatpush3.msra.mxu1 %v2373_v46 }
 0x1ef   :  { %2092 = vmatpush3.msra.mxu0 %v1422_v28  ;;  %2082 = vmatprep.subr.mxu1 %v2119_v47 }
 0x1f0   :  { %2093 = vmatprep.subr.mxu0 %v2119_v47  ;;  %2083 = vmatpush3.msra.mxu1 %v2380_v26 }
 0x1f1   :  { %2094 = vmatpush3.msra.mxu0 %v1429_v33  ;;  %2084 = vmatprep.subr.mxu1 %v2119_v47 }
 0x1f2   :  { %2095 = vmatprep.subr.mxu0 %v2119_v47  ;;  %2085 = vmatpush3.msra.mxu1 %v2367_v14 }
 0x1f3   :  { %2096 = vmatpush3.msra.mxu0 %v1436_v27  ;;  %2086 = vmatprep.subr.mxu1 %v2119_v47 }
 0x1f4   :  { %2097 = vmatprep.subr.mxu0 %v2119_v47  ;;  %2087 = vmatpush3.msra.mxu1 %v2370_v19 }
 0x1f5   :  { %2088 = vmatprep.mubr.msk.f32.mxu1 %vm2120_vm2, %v2119_v47  ;;  %2098 = vmatpush3.msra.mxu0 %v1443_v31 }
 0x1f6   :  { %2089 = vmatmul.mubr.f32.vlgmr.msra.gmra.mxu1 %v1387_v18  ;;  %2102 = vmatprep.subr.mxu1 %v2119_v47 }
 0x1f7   :  { %2099 = vmatprep.mubr.msk.f32.mxu0 %vm2120_vm2, %v2119_v47  ;;  %2103 = vmatpush3.msra.mxu1 %v2373_v46 }
 0x1f8   :  { %2100 = vmatmul.mubr.f32.vlgmr.msra.gmra.mxu0 %v2362_v62  ;;  %2104 = vmatprep.subr.mxu1 %v2119_v47 }
 0x1f9   :  { %2105 = vmatpush3.msra.mxu1 %v2380_v26  ;;  %2110 = vmatprep.mubr.msk.f32.mxu1 %vm2120_vm2, %v2119_v47 }
 0x1fa   :  { %2106 = vmatprep.subr.mxu1 %v2119_v47 }
 0x1fb   :  { %2107 = vmatpush3.msra.mxu1 %v2367_v14 }
 0x1fc   :  { %2108 = vmatprep.subr.mxu1 %v2119_v47 }
 0x1fd   :  { %2109 = vmatpush3.msra.mxu1 %v2370_v19 }
 0x1fe   :  { %2111 = vmatmul.mubr.f32.vlgmr.msra.gmra.mxu1 %v2362_v62 }
 0x2a4   :  { %v1391_v41 = vpop.f32.mrf.mxu0 }
 0x2a5   :  { %v1392_v51 = vadd.f32 %v1391_v41, %v1311_v49 }
 0x2a6   :  { %v2057_v42 = vpop.f32.mrf.mxu0 }
 0x2ac   :  { %v1482_v43 = vpop.f32.mrf.mxu1 }
 0x2ad   :  { %v1483_v52 = vadd.f32 %v1482_v43, %v1392_v51 }
 0x2ae   :  { %v2068_v44 = vpop.f32.mrf.mxu1  ;;  %v1562_v45 = vpop.f32.mrf.mxu0 }
 0x2af   :  { %v1563_v54 = vadd.f32 %v1562_v45, %v1483_v52 }
 0x2b0   :  { %v2079_v50 = vpop.f32.mrf.mxu0 }
 0x2b6   :  { %v1639_v53 = vpop.f32.mrf.mxu1 }
 0x2b7   :  { %v1640_v57 = vadd.f32 %v1639_v53, %v1563_v54 }
 0x2b8   :  { %v2090_v55 = vpop.f32.mrf.mxu1  ;;  %v1722_v56 = vpop.f32.mrf.mxu0 }
 0x2b9   :  { %v1723_v47 = vadd.f32 %v1722_v56, %v1640_v57 }
 0x2ba   :  { %v2101_v58 = vpop.f32.mrf.mxu0 }
 0x2be   :  { %v1797_v59 = vpop.f32.mrf.mxu1 }
 0x2bf   :  { %v1798_v60 = vadd.f32 %v1797_v59, %v1723_v47 }
 0x2c0   :  { %v2112_v61 = vpop.f32.mrf.mxu1 }
 0x2c1   :  { %1802 = vst.msk [vmem:[%s2441_s7] sm:$0xf] %vm1801_vm3, %v1798_v60 }

</bundles_post_ra>
